<compile_context>
chip_gen: v6e
topology: v6e:2x2x1
jax: 0.10.0
libtpu: 0.0.40
codegen_flags: <defaults>
</compile_context>

<pallas_src>
import functools

import jax
import jax.numpy as jnp
from jax.experimental import pallas as pl
from jax.experimental.pallas import tpu as pltpu

_LANES = 128            # vreg lane width
_SUBTILE = 8 * _LANES   # smallest lane-dense (8, 128) output slab -> 1024 rows


def _round_up(x, m):
    return (x + m - 1) // m * m


def _predictor_kernel(xi_ref, xj_ref, w1_ref, b1_ref, w2_ref, b2_ref, o_ref):
    """(x_i * x_j) -> Linear(H,H) -> ReLU -> [dropout=id] -> Linear(H,1)."""
    # Hadamard product of the two node embeddings (VPU).
    h = xi_ref[...] * xj_ref[...]
    # Linear(H, H) + bias + ReLU.  MXU matmul with f32 accumulation.
    h = jnp.dot(h, w1_ref[...], preferred_element_type=jnp.float32) + b1_ref[...]
    h = jnp.maximum(h, 0.0)
    # Dropout: identity in eval mode.
    # Linear(H, 1): VPU multiply + lane reduction against the w2 lane vector
    # (avoids a wasteful (tile, H) @ (H, 1) MXU matvec), emitted directly as a
    # lane-dense (rows, 128) tile so the store is an unmasked vst.
    rows, lanes = o_ref.shape
    h3 = h.reshape(rows, lanes, h.shape[-1])
    out = jnp.sum(h3 * w2_ref[...], axis=-1) + b2_ref[0]
    o_ref[...] = out.astype(o_ref.dtype)


@functools.partial(jax.jit, static_argnames=("tile_n", "compute_dtype"))
def hadamard_mlp_predictor(x_i, x_j, w1, b1, w2, b2, *, tile_n=2048,
                           compute_dtype=jnp.float32):
    """Fused (x_i * x_j) -> Linear -> ReLU -> Linear -> squeeze."""
    N, H = x_i.shape
    assert x_j.shape == (N, H)
    assert tile_n % _SUBTILE == 0, "tile_n must be a multiple of 1024"

    # Tile / padding selection.  For N <= tile_n use one full block (grid=1);
    # otherwise pad N up to a multiple of tile_n (grid >= 2, shards across
    # v7x's two TensorCores via dimension_semantics=("parallel",)).
    n_small = _round_up(max(N, _LANES), _LANES)
    if n_small <= tile_n:
        tile = n_small
        n_pad = n_small
    else:
        tile = tile_n
        n_pad = _round_up(N, tile)
    grid = (n_pad // tile,)

    if n_pad != N:
        pad = ((0, n_pad - N), (0, 0))
        x_i = jnp.pad(x_i, pad)
        x_j = jnp.pad(x_j, pad)

    # Optional low-precision activation/W1 streams (bandwidth win); biases,
    # w2 and all accumulation stay f32.
    x_i = x_i.astype(compute_dtype)
    x_j = x_j.astype(compute_dtype)
    w1_c = w1.astype(compute_dtype)
    b1_2d = b1.reshape(1, H).astype(jnp.float32)
    w2_2d = w2.reshape(1, H).astype(jnp.float32)   # lane vector for VPU reduce
    b2_1d = b2.reshape(1).astype(jnp.float32)      # SMEM scalar

    rows = tile // _LANES
    out = pl.pallas_call(
        _predictor_kernel,
        out_shape=jax.ShapeDtypeStruct((n_pad // _LANES, _LANES), jnp.float32),
        grid_spec=pltpu.PrefetchScalarGridSpec(
            num_scalar_prefetch=0,
            grid=grid,
            in_specs=[
                pl.BlockSpec((tile, H), lambda i: (i, 0)),        # x_i tile
                pl.BlockSpec((tile, H), lambda i: (i, 0)),        # x_j tile
                pl.BlockSpec((H, H), lambda i: (0, 0)),           # W1 (resident)
                pl.BlockSpec((1, H), lambda i: (0, 0)),           # b1
                pl.BlockSpec((1, H), lambda i: (0, 0)),           # w2 lane vec
                pl.BlockSpec(memory_space=pltpu.MemorySpace.SMEM),  # b2 scalar
            ],
            out_specs=pl.BlockSpec((rows, _LANES), lambda i: (i, 0)),
        ),
        compiler_params=pltpu.CompilerParams(
            dimension_semantics=("parallel",),
        ),
    )(x_i, x_j, w1_c, b1_2d, w2_2d, b2_1d)
    # Lane-dense slab -> (N,)  (== torch .squeeze()).
    return out.reshape(-1)[:N]


def _init_linear_params(key, in_feats, out_feats):
    """Deterministic init mimicking torch.nn.Linear (uniform +/- 1/sqrt(in))."""
    k_w, k_b = jax.random.split(key)
    bound = 1.0 / jnp.sqrt(in_feats)
    # stored as (in, out) so the kernel can do x @ W
    w = jax.random.uniform(k_w, (in_feats, out_feats), jnp.float32, -bound, bound)
    b = jax.random.uniform(k_b, (out_feats,), jnp.float32, -bound, bound)
    return w, b


if __name__ == "__main__":
    key = jax.random.PRNGKey(0)
    k_xi, k_xj, k_w1, k_w2, k_big = jax.random.split(key, 5)

    H = 128
    w1, b1 = _init_linear_params(k_w1, H, H)   # Linear(h_feats, h_feats)
    w2, b2 = _init_linear_params(k_w2, H, 1)   # Linear(h_feats, 1)

    def ref_fn(xi, xj):
        return (jnp.maximum((xi * xj) @ w1 + b1, 0.0) @ w2 + b2)[:, 0]

    # 1) Small batch: single full-block grid.
    N = 256
    x_i = jax.random.normal(k_xi, (N, H), jnp.float32)
    x_j = jax.random.normal(k_xj, (N, H), jnp.float32)
    out = jax.block_until_ready(hadamard_mlp_predictor(x_i, x_j, w1, b1, w2, b2))
    assert out.shape == (N,)
    assert jnp.allclose(out, ref_fn(x_i, x_j), atol=1e-4, rtol=1e-4), "mismatch (small)"

    # 2) Ragged batch (N not a multiple of the tile): padding + multi-tile grid.
    N2 = 2500
    k_a, k_c = jax.random.split(k_big)
    x_i2 = jax.random.normal(k_a, (N2, H), jnp.float32)
    x_j2 = jax.random.normal(k_c, (N2, H), jnp.float32)
    out2 = jax.block_until_ready(
        hadamard_mlp_predictor(x_i2, x_j2, w1, b1, w2, b2, tile_n=1024))
    assert out2.shape == (N2,)
    assert jnp.allclose(out2, ref_fn(x_i2, x_j2), atol=1e-4, rtol=1e-4), "mismatch (ragged)"

    print("KERNEL_OK")
</pallas_src>

<mosaic_0001>
module attributes {stable_mosaic.version = 11 : i64} {
  func.func @_predictor_kernel(%arg0: i32, %arg1: memref<256x128xf32, #tpu.memory_space<vmem>>, %arg2: memref<256x128xf32, #tpu.memory_space<vmem>>, %arg3: memref<128x128xf32, #tpu.memory_space<vmem>>, %arg4: memref<1x128xf32, #tpu.memory_space<vmem>>, %arg5: memref<1x128xf32, #tpu.memory_space<vmem>>, %arg6: memref<1xf32, #tpu.memory_space<smem>>, %arg7: memref<2x128xf32, #tpu.memory_space<vmem>>) attributes {dimension_semantics = [#tpu.dimension_semantics<parallel>], iteration_bounds = array<i64: 1>, scalar_prefetch = 0 : i64, scratch_operands = 0 : i64, tpu.core_type = #tpu.core_type<tc>, window_params = [{transform_indices = @transform_0, window_bounds = array<i64: 256, 128>}, {transform_indices = @transform_1, window_bounds = array<i64: 256, 128>}, {pipeline_mode = #tpu.pipeline_mode<synchronous>, transform_indices = @transform_2, window_bounds = array<i64: 128, 128>}, {pipeline_mode = #tpu.pipeline_mode<synchronous>, transform_indices = @transform_3, window_bounds = array<i64: 1, 128>}, {pipeline_mode = #tpu.pipeline_mode<synchronous>, transform_indices = @transform_4, window_bounds = array<i64: 1, 128>}, {transform_indices = @transform_5, window_bounds = array<i64: 1>}, {transform_indices = @transform_6, window_bounds = array<i64: 2, 128>}]} {
    %c0 = arith.constant 0 : index
    %c0_0 = arith.constant 0 : index
    %0 = vector.load %arg1[%c0, %c0_0] : memref<256x128xf32, #tpu.memory_space<vmem>>, vector<256x128xf32>
    %c0_1 = arith.constant 0 : index
    %c0_2 = arith.constant 0 : index
    %1 = vector.load %arg2[%c0_1, %c0_2] : memref<256x128xf32, #tpu.memory_space<vmem>>, vector<256x128xf32>
    %2 = arith.mulf %0, %1 : vector<256x128xf32>
    %c0_3 = arith.constant 0 : index
    %c0_4 = arith.constant 0 : index
    %3 = vector.load %arg3[%c0_3, %c0_4] : memref<128x128xf32, #tpu.memory_space<vmem>>, vector<128x128xf32>
    %cst = arith.constant dense<0.000000e+00> : vector<256x128xf32>
    %4 = tpu.matmul %2, %3, %cst {dimension_numbers = #tpu.dot_dimension_numbers<[1], [0], [0], [1], [0, 0, 1, 1], [], []>} : vector<256x128xf32>, vector<128x128xf32>, vector<256x128xf32> -> vector<256x128xf32>
    %c0_5 = arith.constant 0 : index
    %c0_6 = arith.constant 0 : index
    %5 = vector.load %arg4[%c0_5, %c0_6] : memref<1x128xf32, #tpu.memory_space<vmem>>, vector<1x128xf32>
    %6 = vector.broadcast %5 : vector<1x128xf32> to vector<256x128xf32>
    %7 = arith.addf %4, %6 : vector<256x128xf32>
    %cst_7 = arith.constant 0.000000e+00 : f32
    %8 = vector.broadcast %cst_7 : f32 to vector<256x128xf32>
    %9 = arith.maximumf %7, %8 : vector<256x128xf32>
    %10 = vector.shape_cast %9 : vector<256x128xf32> to vector<2x128x128xf32>
    %c0_8 = arith.constant 0 : index
    %c0_9 = arith.constant 0 : index
    %11 = vector.load %arg5[%c0_8, %c0_9] : memref<1x128xf32, #tpu.memory_space<vmem>>, vector<1x128xf32>
    %12 = vector.shape_cast %11 : vector<1x128xf32> to vector<1x1x128xf32>
    %13 = vector.broadcast %12 : vector<1x1x128xf32> to vector<2x128x128xf32>
    %14 = arith.mulf %10, %13 : vector<2x128x128xf32>
    %cst_10 = arith.constant dense<0.000000e+00> : vector<2x128xf32>
    %15 = vector.multi_reduction <add>, %14, %cst_10 [2] : vector<2x128x128xf32> to vector<2x128xf32>
    %c0_11 = arith.constant 0 : index
    %16 = memref.load %arg6[%c0_11] : memref<1xf32, #tpu.memory_space<smem>>
    %17 = vector.broadcast %16 : f32 to vector<2x128xf32>
    %18 = arith.addf %15, %17 : vector<2x128xf32>
    %c0_12 = arith.constant 0 : index
    %c0_13 = arith.constant 0 : index
    %19 = vector.load %arg7[%c0_12, %c0_13] : memref<2x128xf32, #tpu.memory_space<vmem>>, vector<2x128xf32>
    tpu.vector_store %arg7[%c0_12, %c0_13], %18 {strides = array<i32>} : memref<2x128xf32, #tpu.memory_space<vmem>>, vector<2x128xf32>,
    return
  }
  func.func @transform_0(%arg0: i32) -> (i32, i32) {
    %c0_i32 = arith.constant 0 : i32
    %c0_i32_0 = arith.constant 0 : i32
    return %arg0, %c0_i32 : i32, i32
  }
  func.func @transform_1(%arg0: i32) -> (i32, i32) {
    %c0_i32 = arith.constant 0 : i32
    %c0_i32_0 = arith.constant 0 : i32
    return %arg0, %c0_i32 : i32, i32
  }
  func.func @transform_2(%arg0: i32) -> (i32, i32) {
    %c0_i32 = arith.constant 0 : i32
    %c0_i32_0 = arith.constant 0 : i32
    %c0_i32_1 = arith.constant 0 : i32
    return %c0_i32, %c0_i32_0 : i32, i32
  }
  func.func @transform_3(%arg0: i32) -> (i32, i32) {
    %c0_i32 = arith.constant 0 : i32
    %c0_i32_0 = arith.constant 0 : i32
    %c0_i32_1 = arith.constant 0 : i32
    return %c0_i32, %c0_i32_0 : i32, i32
  }
  func.func @transform_4(%arg0: i32) -> (i32, i32) {
    %c0_i32 = arith.constant 0 : i32
    %c0_i32_0 = arith.constant 0 : i32
    %c0_i32_1 = arith.constant 0 : i32
    return %c0_i32, %c0_i32_0 : i32, i32
  }
  func.func @transform_5(%arg0: i32) -> i32 {
    %c0_i32 = arith.constant 0 : i32
    %c0_i32_0 = arith.constant 0 : i32
    return %c0_i32 : i32
  }
  func.func @transform_6(%arg0: i32) -> (i32, i32) {
    %c0_i32 = arith.constant 0 : i32
    %c0_i32_0 = arith.constant 0 : i32
    return %arg0, %c0_i32 : i32, i32
  }
}

</mosaic_0001>

<bundles_post_ra>
// kernel: hadamard_mlp_predictor.1
= control target key start
LH: loop header
LB: loop body
LE: loop exit
PB: predicated region body
PF: predicated region fallthrough
CT: control target
= control target key end

     0   :  { %12 = vsyncpa [#allocation4], 0  ;;  %s1329_s0 = inlined_call_operand.hbm [shape: f32[256,128], index: 0, kind: input, shape index: {}]   ;;  %s1330_s1 = inlined_call_operand.hbm [shape: f32[256,128], index: 1, kind: input, shape index: {}]   ;;  %s1331_s2 = inlined_call_operand.hbm [shape: f32[128,128], index: 2, kind: input, shape index: {}]   ;;  %s1332_s3 = inlined_call_operand.vmem [shape: f32[1,128], index: 3, kind: input, shape index: {}]   ;;  %s1333_s4 = inlined_call_operand.vmem [shape: f32[1,128], index: 4, kind: input, shape index: {}]   ;;  %s1334_s5 = inlined_call_operand.<no memory space> [shape: f32[1], index: 5, kind: input, shape index: {}]   ;;  %s1335_s6 = inlined_call_operand.hbm [shape: f32[2,128], index: 6, kind: output, shape index: {}]  }
   0x1   :  { %13 = vsyncpa [#allocation7], 0 }
   0x2   :  { %14 = vsyncpa [#allocation5], 0  ;;  %s1075_s21 = smov [#allocation6]   ;;  %s1076_s23 = smov [#allocation3]  }
   0x3   :  { %s32_s22 = sshll.u32 %s1075_s21, 4  ;;  %s20_s24 = sshll.u32 %s1076_s23, 4  ;;  %s33_s22 = int_to_ptr.vmem [resolvable:$true] %s32_s22  ;;  %s21_s24 = int_to_ptr.vmem [resolvable:$true] %s20_s24 }
   0x4   :  { %s997_s25 = scalar_lea.vmem %s33_s22, 4096  ;;  %p1002_p1 = scmp.lt.s32.totalorder %s33_s22, %s33_s22 }
   0x5   :  { %p998_p0 = scmp.ne.s32.totalorder %s33_s22, %s997_s25  ;;  %p1003_p2 = scmp.lt.s32.totalorder %s997_s25, %s997_s25 }
   0x7   :  { %p1004_p3 = por %p1003_p2, %p1002_p1 }
   0x9   :  { %p1005_p4 = pnand %p1004_p3, %p998_p0 }
   0xb   :  { %1008 = shalt.err (!%p1005_p4)
}
   0xc   :  { %s1077_s26 = smov 128   ;;  %s1078_s27 = smov 8  }
   0xd   :  { %38 = dma.hbm_to_vmem [thread:$0]  %s1330_s1, 4096, %s33_s22, [#allocation7], %s1077_s26, %s1077_s26, %s1078_s27  }
   0xe   :  { %s1017_s30 = scalar_lea.vmem %s21_s24, 4096  ;;  %p1022_p6 = scmp.lt.s32.totalorder %s21_s24, %s21_s24 }
   0xf   :  { %p1018_p5 = scmp.ne.s32.totalorder %s21_s24, %s1017_s30  ;;  %p1023_p7 = scmp.lt.s32.totalorder %s1017_s30, %s1017_s30 }
  0x11   :  { %p1024_p8 = por %p1023_p7, %p1022_p6 }
  0x13   :  { %p1025_p9 = pnand %p1024_p8, %p1018_p5 }
  0x15   :  { %1028 = shalt.err (!%p1025_p9)
}
  0x16   :  { %26 = dma.hbm_to_vmem [thread:$0]  %s1329_s0, 4096, %s21_s24, [#allocation4], %s1077_s26, %s1077_s26, %s1078_s27  }
  0x17   :  { %s1079_s9 = smov [#allocation8]  }
  0x18   :  { %s44_s10 = sshll.u32 %s1079_s9, 4  ;;  %s45_s10 = int_to_ptr.vmem [resolvable:$true] %s44_s10 }
  0x19   :  { %s1037_s11 = scalar_lea.vmem %s45_s10, 2048  ;;  %p1042_p11 = scmp.lt.s32.totalorder %s45_s10, %s45_s10 }
  0x1a   :  { %p1038_p10 = scmp.ne.s32.totalorder %s45_s10, %s1037_s11  ;;  %p1043_p12 = scmp.lt.s32.totalorder %s1037_s11, %s1037_s11 }
  0x1c   :  { %p1044_p13 = por %p1043_p12, %p1042_p11 }
  0x1e   :  { %p1045_p0 = pnand %p1044_p13, %p1038_p10 }
  0x20   :  { %1048 = shalt.err (!%p1045_p0)
}
  0x21   :  { %50 = dma.hbm_to_vmem [thread:$0]  %s1331_s2, 2048, %s45_s10, [#allocation7], %s1077_s26, %s1077_s26, %s1078_s27  }
  0x22   :  { %1069 = dma.done.wait [#allocation4], 4096  }
  0x23   :  { %1070 = vsyncadd [#allocation4], 4294963200 }
  0x24   :  { %1071 = dma.done.wait [#allocation7], 6144  }
  0x25   :  { %1072 = vsyncadd [#allocation7], 4294961152  ;;  %v177_v0 = vld [vmem:[#allocation8 + $0x78] sm:$0xff]  ;;  %v176_v1 = vld [vmem:[#allocation8 + $0x70] sm:$0xff]  ;;  %vm622_vm0 = vcmask 130112   ;;  %vm629_vm1 = vcmask 195712  }
  0x26   :  { %871 = vmatprep.subr.mxu0 %v177_v0  ;;  %951 = vmatprep.subr.mxu1 %v177_v0  ;;  %v175_v2 = vld [vmem:[#allocation8 + $0x68] sm:$0xff]  ;;  %v174_v3 = vld [vmem:[#allocation8 + $0x60] sm:$0xff]  ;;  %v173_v4 = vld [vmem:[#allocation8 + $0x58] sm:$0xff]  ;;  %vm636_vm2 = vcmask 261312   ;;  %vm643_vm3 = vcmask 326912   ;;  %vm650_vm4 = vcmask 392512  }
  0x27   :  { %872 = vmatpush3.msra.mxu0 %v177_v0  ;;  %967 = vmatpush3.msra.mxu1 %v177_v0  ;;  %v172_v5 = vld [vmem:[#allocation8 + $0x50] sm:$0xff]  ;;  %v171_v6 = vld [vmem:[#allocation8 + $0x48] sm:$0xff]  ;;  %v170_v7 = vld [vmem:[#allocation8 + $0x40] sm:$0xff]  ;;  %vm657_vm5 = vcmask 458112   ;;  %vm664_vm6 = vcmask 523712   ;;  %vm671_vm7 = vcmask 589312  }
  0x28   :  { %873 = vmatprep.subr.mxu0 %v176_v1  ;;  %952 = vmatprep.subr.mxu1 %v176_v1  ;;  %v169_v8 = vld [vmem:[#allocation8 + $0x38] sm:$0xff]  ;;  %v168_v9 = vld [vmem:[#allocation8 + $0x30] sm:$0xff]  ;;  %v167_v10 = vld [vmem:[#allocation8 + $0x28] sm:$0xff]  ;;  %vm678_vm8 = vcmask 654912   ;;  %vm685_vm9 = vcmask 720512   ;;  %vm692_vm10 = vcmask 786112  }
  0x29   :  { %874 = vmatpush3.msra.mxu0 %v176_v1  ;;  %968 = vmatpush3.msra.mxu1 %v176_v1  ;;  %v166_v11 = vld [vmem:[#allocation8 + $0x20] sm:$0xff]  ;;  %v165_v12 = vld [vmem:[#allocation8 + $0x18] sm:$0xff]  ;;  %v164_v13 = vld [vmem:[#allocation8 + $0x10] sm:$0xff]  ;;  %vm699_vm11 = vcmask 851712   ;;  %vm706_vm12 = vcmask 917312   ;;  %vm713_vm13 = vcmask 982912  }
  0x2a   :  { %875 = vmatprep.subr.mxu0 %v175_v2  ;;  %953 = vmatprep.subr.mxu1 %v175_v2  ;;  %v163_v14 = vld [vmem:[#allocation8 + $0x8] sm:$0xff]  ;;  %v66_v15 = vld [vmem:[#allocation3] sm:$0xff]  ;;  %v68_v24 = vld [vmem:[#allocation3 + $0x10] sm:$0xff]  ;;  %vm720_vm14 = vcmask 1048512   ;;  %vm801_vm15 = vcmask 1041409  }
  0x2b   :  { %876 = vmatpush3.msra.mxu0 %v175_v2  ;;  %969 = vmatpush3.msra.mxu1 %v175_v2  ;;  %v98_v16 = vld [vmem:[#allocation6] sm:$0xff]  ;;  %v67_v20 = vld [vmem:[#allocation3 + $0x8] sm:$0xff]  ;;  %v100_v25 = vld [vmem:[#allocation6 + $0x10] sm:$0xff] }
  0x2c   :  { %877 = vmatprep.subr.mxu0 %v174_v3  ;;  %954 = vmatprep.subr.mxu1 %v174_v3  ;;  %v82_v17 = vld [vmem:[#allocation3 + $0x80] sm:$0xff]  ;;  %v99_v21 = vld [vmem:[#allocation6 + $0x8] sm:$0xff]  ;;  %v84_v26 = vld [vmem:[#allocation3 + $0x90] sm:$0xff]  ;;  %v130_v28 = vmul.f32 %v98_v16, %v66_v15  ;;  %v132_v34 = vmul.f32 %v100_v25, %v68_v24 }
  0x2d   :  { %878 = vmatpush3.msra.mxu0 %v174_v3  ;;  %970 = vmatpush3.msra.mxu1 %v174_v3  ;;  %v162_v18 = vld [vmem:[#allocation8] sm:$0xff]  ;;  %v83_v22 = vld [vmem:[#allocation3 + $0x88] sm:$0xff]  ;;  %v116_v27 = vld [vmem:[#allocation6 + $0x90] sm:$0xff]  ;;  %v131_v30 = vmul.f32 %v99_v21, %v67_v20 }
  0x2e   :  { %879 = vmatprep.subr.mxu0 %v173_v4  ;;  %955 = vmatprep.subr.mxu1 %v173_v4  ;;  %v114_v19 = vld [vmem:[#allocation6 + $0x80] sm:$0xff]  ;;  %v115_v23 = vld [vmem:[#allocation6 + $0x88] sm:$0xff]  ;;  %v69_v32 = vld [vmem:[#allocation3 + $0x18] sm:$0xff]  ;;  %v148_v35 = vmul.f32 %v116_v27, %v84_v26 }
  0x2f   :  { %880 = vmatpush3.msra.mxu0 %v173_v4  ;;  %971 = vmatpush3.msra.mxu1 %v173_v4  ;;  %v146_v29 = vmul.f32 %v114_v19, %v82_v17  ;;  %v147_v31 = vmul.f32 %v115_v23, %v83_v22  ;;  %v101_v33 = vld [vmem:[#allocation6 + $0x18] sm:$0xff]  ;;  %v70_v38 = vld [vmem:[#allocation3 + $0x20] sm:$0xff]  ;;  %v71_v44 = vld [vmem:[#allocation3 + $0x28] sm:$0xff] }
  0x30   :  { %881 = vmatprep.subr.mxu0 %v172_v5  ;;  %956 = vmatprep.subr.mxu1 %v172_v5  ;;  %v85_v36 = vld [vmem:[#allocation3 + $0x98] sm:$0xff]  ;;  %v102_v39 = vld [vmem:[#allocation6 + $0x20] sm:$0xff]  ;;  %v133_v42 = vmul.f32 %v101_v33, %v69_v32  ;;  %v103_v45 = vld [vmem:[#allocation6 + $0x28] sm:$0xff] }
  0x31   :  { %882 = vmatpush3.msra.mxu0 %v172_v5  ;;  %972 = vmatpush3.msra.mxu1 %v172_v5  ;;  %v117_v37 = vld [vmem:[#allocation6 + $0x98] sm:$0xff]  ;;  %v86_v40 = vld [vmem:[#allocation3 + $0xa0] sm:$0xff]  ;;  %v134_v46 = vmul.f32 %v102_v39, %v70_v38  ;;  %v87_v48 = vld [vmem:[#allocation3 + $0xa8] sm:$0xff]  ;;  %v135_v54 = vmul.f32 %v103_v45, %v71_v44 }
  0x32   :  { %883 = vmatprep.subr.mxu0 %v171_v6  ;;  %957 = vmatprep.subr.mxu1 %v171_v6  ;;  %v118_v41 = vld [vmem:[#allocation6 + $0xa0] sm:$0xff]  ;;  %v149_v43 = vmul.f32 %v117_v37, %v85_v36  ;;  %v119_v49 = vld [vmem:[#allocation6 + $0xa8] sm:$0xff]  ;;  %v72_v50 = vld [vmem:[#allocation3 + $0x30] sm:$0xff] }
  0x33   :  { %884 = vmatpush3.msra.mxu0 %v171_v6  ;;  %973 = vmatpush3.msra.mxu1 %v171_v6  ;;  %v150_v47 = vmul.f32 %v118_v41, %v86_v40  ;;  %v104_v51 = vld [vmem:[#allocation6 + $0x30] sm:$0xff]  ;;  %v151_v55 = vmul.f32 %v119_v49, %v87_v48  ;;  %v73_v56 = vld [vmem:[#allocation3 + $0x38] sm:$0xff]  ;;  %v74_v62 = vld [vmem:[#allocation3 + $0x40] sm:$0xff] }
  0x34   :  { %885 = vmatprep.subr.mxu0 %v170_v7  ;;  %958 = vmatprep.subr.mxu1 %v170_v7  ;;  %v88_v52 = vld [vmem:[#allocation3 + $0xb0] sm:$0xff]  ;;  %v105_v57 = vld [vmem:[#allocation6 + $0x38] sm:$0xff]  ;;  %v136_v58 = vmul.f32 %v104_v51, %v72_v50  ;;  %v106_v63 = vld [vmem:[#allocation6 + $0x40] sm:$0xff] }
  0x35   :  { %886 = vmatpush3.msra.mxu0 %v170_v7  ;;  %974 = vmatpush3.msra.mxu1 %v170_v7  ;;  %v120_v53 = vld [vmem:[#allocation6 + $0xb0] sm:$0xff]  ;;  %v89_v60 = vld [vmem:[#allocation3 + $0xb8] sm:$0xff]  ;;  %v90_v0 = vld [vmem:[#allocation3 + $0xc0] sm:$0xff]  ;;  %v137_v2 = vmul.f32 %v105_v57, %v73_v56  ;;  %v138_v6 = vmul.f32 %v106_v63, %v74_v62 }
  0x36   :  { %887 = vmatprep.subr.mxu0 %v169_v8  ;;  %959 = vmatprep.subr.mxu1 %v169_v8  ;;  %v152_v59 = vmul.f32 %v120_v53, %v88_v52  ;;  %v121_v61 = vld [vmem:[#allocation6 + $0xb8] sm:$0xff]  ;;  %v122_v1 = vld [vmem:[#allocation6 + $0xc0] sm:$0xff]  ;;  %v75_v4 = vld [vmem:[#allocation3 + $0x48] sm:$0xff] }
  0x37   :  { %888 = vmatpush3.msra.mxu0 %v169_v8  ;;  %975 = vmatpush3.msra.mxu1 %v169_v8  ;;  %v153_v3 = vmul.f32 %v121_v61, %v89_v60  ;;  %v107_v5 = vld [vmem:[#allocation6 + $0x48] sm:$0xff]  ;;  %v154_v7 = vmul.f32 %v122_v1, %v90_v0  ;;  %v77_v16 = vld [vmem:[#allocation3 + $0x58] sm:$0xff]  ;;  %v78_v22 = vld [vmem:[#allocation3 + $0x60] sm:$0xff] }
  0x38   :  { %889 = vmatprep.subr.mxu0 %v168_v9  ;;  %960 = vmatprep.subr.mxu1 %v168_v9  ;;  %v91_v8 = vld [vmem:[#allocation3 + $0xc8] sm:$0xff]  ;;  %v109_v17 = vld [vmem:[#allocation6 + $0x58] sm:$0xff]  ;;  %v110_v23 = vld [vmem:[#allocation6 + $0x60] sm:$0xff] }
  0x39   :  { %890 = vmatpush3.msra.mxu0 %v168_v9  ;;  %976 = vmatpush3.msra.mxu1 %v168_v9  ;;  %v123_v9 = vld [vmem:[#allocation6 + $0xc8] sm:$0xff]  ;;  %v93_v20 = vld [vmem:[#allocation3 + $0xd8] sm:$0xff]  ;;  %v94_v24 = vld [vmem:[#allocation3 + $0xe0] sm:$0xff]  ;;  %v141_v26 = vmul.f32 %v109_v17, %v77_v16 }
  0x3a   :  { %891 = vmatprep.subr.mxu0 %v167_v10  ;;  %961 = vmatprep.subr.mxu1 %v167_v10  ;;  %v155_v15 = vmul.f32 %v123_v9, %v91_v8  ;;  %v125_v21 = vld [vmem:[#allocation6 + $0xd8] sm:$0xff]  ;;  %v126_v25 = vld [vmem:[#allocation6 + $0xe0] sm:$0xff]  ;;  %v95_v32 = vld [vmem:[#allocation3 + $0xe8] sm:$0xff] }
  0x3b   :  { %892 = vmatpush3.msra.mxu0 %v167_v10  ;;  %977 = vmatpush3.msra.mxu1 %v167_v10  ;;  %v76_v10 = vld [vmem:[#allocation3 + $0x50] sm:$0xff]  ;;  %v157_v27 = vmul.f32 %v125_v21, %v93_v20  ;;  %v127_v33 = vld [vmem:[#allocation6 + $0xe8] sm:$0xff]  ;;  %v81_v40 = vld [vmem:[#allocation3 + $0x78] sm:$0xff] }
  0x3c   :  { %893 = vmatprep.subr.mxu0 %v166_v11  ;;  %962 = vmatprep.subr.mxu1 %v166_v11  ;;  %v96_v36 = vld [vmem:[#allocation3 + $0xf0] sm:$0xff]  ;;  %v159_v39 = vmul.f32 %v127_v33, %v95_v32  ;;  %v97_v44 = vld [vmem:[#allocation3 + $0xf8] sm:$0xff]  ;;  %v1128_v48 = vld [vmem:[%s1332_s3] ss:$0 sm:$0xff] }
  0x3d   :  { %894 = vmatpush3.msra.mxu0 %v166_v11  ;;  %978 = vmatpush3.msra.mxu1 %v166_v11  ;;  %v108_v11 = vld [vmem:[#allocation6 + $0x50] sm:$0xff]  ;;  %v129_v45 = vld [vmem:[#allocation6 + $0xf8] sm:$0xff] }
  0x3e   :  { %895 = vmatprep.subr.mxu0 %v165_v12  ;;  %963 = vmatprep.subr.mxu1 %v165_v12  ;;  %v128_v37 = vld [vmem:[#allocation6 + $0xf0] sm:$0xff] }
  0x3f   :  { %896 = vmatpush3.msra.mxu0 %v165_v12  ;;  %979 = vmatpush3.msra.mxu1 %v165_v12  ;;  %v92_v12 = vld [vmem:[#allocation3 + $0xd0] sm:$0xff] }
  0x40   :  { %897 = vmatprep.subr.mxu0 %v164_v13  ;;  %964 = vmatprep.subr.mxu1 %v164_v13 }
  0x41   :  { %898 = vmatpush3.msra.mxu0 %v164_v13  ;;  %980 = vmatpush3.msra.mxu1 %v164_v13  ;;  %v124_v13 = vld [vmem:[#allocation6 + $0xd0] sm:$0xff] }
  0x42   :  { %899 = vmatprep.subr.mxu0 %v163_v14  ;;  %965 = vmatprep.subr.mxu1 %v163_v14  ;;  %v156_v19 = vmul.f32 %v124_v13, %v92_v12 }
  0x43   :  { %900 = vmatpush3.msra.mxu0 %v163_v14  ;;  %981 = vmatpush3.msra.mxu1 %v163_v14  ;;  %v139_v14 = vmul.f32 %v107_v5, %v75_v4 }
  0x44   :  { %901 = vmatprep.subr.mxu0 %v162_v18  ;;  %966 = vmatprep.subr.mxu1 %v162_v18 }
  0x45   :  { %902 = vmatpush3.msra.mxu0 %v162_v18  ;;  %982 = vmatpush3.msra.mxu1 %v162_v18  ;;  %v140_v18 = vmul.f32 %v108_v11, %v76_v10 }
  0x46   :  { %903 = vmatprep.mubr.f32.mxu0 %v130_v28  ;;  %927 = vmatprep.mubr.f32.mxu1 %v146_v29  ;;  %v79_v28 = vld [vmem:[#allocation3 + $0x68] sm:$0xff] }
  0x47   :  { %904 = vmatmul.mubr.f32.vlgmr.msra.gmra.mxu0 %v131_v30  ;;  %928 = vmatmul.mubr.f32.vlgmr.msra.gmra.mxu1 %v147_v31  ;;  %v111_v29 = vld [vmem:[#allocation6 + $0x68] sm:$0xff]  ;;  %v142_v30 = vmul.f32 %v110_v23, %v78_v22  ;;  %v158_v31 = vmul.f32 %v126_v25, %v94_v24 }
  0x48   :  { %906 = vmatprep.mubr.f32.mxu0 %v132_v34  ;;  %930 = vmatprep.mubr.f32.mxu1 %v148_v35  ;;  %v80_v34 = vld [vmem:[#allocation3 + $0x70] sm:$0xff]  ;;  %v143_v38 = vmul.f32 %v111_v29, %v79_v28 }
  0x49   :  { %v112_v35 = vld [vmem:[#allocation6 + $0x70] sm:$0xff] }
  0x4a   :  { %v144_v41 = vmul.f32 %v112_v35, %v80_v34 }
  0x4b   :  { %907 = vmatmul.mubr.f32.gmra.mxu0 %v133_v42  ;;  %931 = vmatmul.mubr.f32.gmra.mxu1 %v149_v43  ;;  %v160_v42 = vmul.f32 %v128_v37, %v96_v36  ;;  %v113_v43 = vld [vmem:[#allocation6 + $0x78] sm:$0xff] }
  0x4c   :  { %909 = vmatprep.mubr.f32.mxu0 %v134_v46  ;;  %933 = vmatprep.mubr.f32.mxu1 %v150_v47  ;;  %v145_v46 = vmul.f32 %v113_v43, %v81_v40  ;;  %v161_v47 = vmul.f32 %v129_v45, %v97_v44 }
  0x4f   :  { %910 = vmatmul.mubr.f32.gmra.mxu0 %v135_v54  ;;  %934 = vmatmul.mubr.f32.gmra.mxu1 %v151_v55 }
  0x50   :  { %912 = vmatprep.mubr.f32.mxu0 %v136_v58  ;;  %936 = vmatprep.mubr.f32.mxu1 %v152_v59  ;;  %v1137_v59 = vld [vmem:[%s1333_s4] ss:$0 sm:$0xff] }
  0x53   :  { %913 = vmatmul.mubr.f32.gmra.mxu0 %v137_v2  ;;  %937 = vmatmul.mubr.f32.gmra.mxu1 %v153_v3 }
  0x54   :  { %915 = vmatprep.mubr.f32.mxu0 %v138_v6  ;;  %939 = vmatprep.mubr.f32.mxu1 %v154_v7 }
  0x57   :  { %916 = vmatmul.mubr.f32.gmra.mxu0 %v139_v14  ;;  %940 = vmatmul.mubr.f32.gmra.mxu1 %v155_v15 }
  0x58   :  { %918 = vmatprep.mubr.f32.mxu0 %v140_v18  ;;  %942 = vmatprep.mubr.f32.mxu1 %v156_v19 }
  0x5b   :  { %919 = vmatmul.mubr.f32.gmra.mxu0 %v141_v26  ;;  %943 = vmatmul.mubr.f32.gmra.mxu1 %v157_v27 }
  0x5c   :  { %921 = vmatprep.mubr.f32.mxu0 %v142_v30  ;;  %945 = vmatprep.mubr.f32.mxu1 %v158_v31 }
  0x5f   :  { %922 = vmatmul.mubr.f32.gmra.mxu0 %v143_v38  ;;  %946 = vmatmul.mubr.f32.gmra.mxu1 %v159_v39 }
  0x60   :  { %924 = vmatprep.mubr.f32.mxu0 %v144_v41  ;;  %948 = vmatprep.mubr.f32.mxu1 %v160_v42 }
  0x63   :  { %925 = vmatmul.mubr.f32.gmra.mxu0 %v145_v46  ;;  %949 = vmatmul.mubr.f32.gmra.mxu1 %v161_v47 }
 0x107   :  { %v905_v49 = vpop.f32.mrf.mxu0  ;;  %v929_v50 = vpop.f32.mrf.mxu1 }
 0x108   :  { %v257_v51 = vadd.f32 %v905_v49, %v1128_v48  ;;  %v337_v52 = vadd.f32 %v929_v50, %v1128_v48 }
 0x109   :  { %v251_v53 = vpop.f32.mrf.mxu0  ;;  %v331_v54 = vpop.f32.mrf.mxu1 }
 0x10a   :  { %v411_v55 = vmax.f32 %v257_v51, 0.0  ;;  %v427_v56 = vmax.f32 %v337_v52, 0.0  ;;  %v252_v57 = vadd.f32 %v1128_v48, %v251_v53  ;;  %v332_v58 = vadd.f32 %v1128_v48, %v331_v54 }
 0x10b   :  { %v908_v60 = vpop.f32.mrf.mxu0  ;;  %v932_v61 = vpop.f32.mrf.mxu1 }
 0x10c   :  { %v267_v62 = vadd.f32 %v908_v60, %v1128_v48  ;;  %v347_v63 = vadd.f32 %v932_v61, %v1128_v48  ;;  %v410_v0 = vmax.f32 %v252_v57, 0.0  ;;  %v426_v1 = vmax.f32 %v332_v58, 0.0 }
 0x10d   :  { %v466_v2 = vmul.f32 %v1137_v59, %v427_v56  ;;  %v450_v3 = vmul.f32 %v1137_v59, %v411_v55  ;;  %v261_v4 = vpop.f32.mrf.mxu0  ;;  %v341_v5 = vpop.f32.mrf.mxu1 }
 0x10e   :  { %v413_v6 = vmax.f32 %v267_v62, 0.0  ;;  %v429_v7 = vmax.f32 %v347_v63, 0.0  ;;  %v262_v8 = vadd.f32 %v1128_v48, %v261_v4  ;;  %v342_v9 = vadd.f32 %v1128_v48, %v341_v5 }
 0x10f   :  { %515 = vadd.xlane.f32.xlu1 %v466_v2  ;;  %483 = vadd.xlane.f32.xlu0 %v450_v3  ;;  %v465_v10 = vmul.f32 %v1137_v59, %v426_v1  ;;  %v449_v11 = vmul.f32 %v1137_v59, %v410_v0  ;;  %v911_v12 = vpop.f32.mrf.mxu0  ;;  %v935_v14 = vpop.f32.mrf.mxu1 }
 0x110   :  { %v277_v13 = vadd.f32 %v911_v12, %v1128_v48  ;;  %v357_v15 = vadd.f32 %v935_v14, %v1128_v48  ;;  %v468_v16 = vmul.f32 %v1137_v59, %v429_v7  ;;  %v452_v17 = vmul.f32 %v1137_v59, %v413_v6 }
 0x111   :  { %v412_v18 = vmax.f32 %v262_v8, 0.0  ;;  %v428_v19 = vmax.f32 %v342_v9, 0.0  ;;  %v271_v20 = vpop.f32.mrf.mxu0  ;;  %v351_v21 = vpop.f32.mrf.mxu1 }
 0x112   :  { %v415_v22 = vmax.f32 %v277_v13, 0.0  ;;  %v431_v23 = vmax.f32 %v357_v15, 0.0  ;;  %v272_v24 = vadd.f32 %v1128_v48, %v271_v20  ;;  %v352_v25 = vadd.f32 %v1128_v48, %v351_v21 }
 0x113   :  { %513 = vadd.xlane.f32.xlu1 %v465_v10  ;;  %481 = vadd.xlane.f32.xlu0 %v449_v11  ;;  %v467_v26 = vmul.f32 %v1137_v59, %v428_v19  ;;  %v451_v27 = vmul.f32 %v1137_v59, %v412_v18  ;;  %v914_v28 = vpop.f32.mrf.mxu0  ;;  %v938_v30 = vpop.f32.mrf.mxu1 }
 0x114   :  { %v287_v29 = vadd.f32 %v914_v28, %v1128_v48  ;;  %v367_v31 = vadd.f32 %v938_v30, %v1128_v48  ;;  %v470_v32 = vmul.f32 %v1137_v59, %v431_v23  ;;  %v454_v33 = vmul.f32 %v1137_v59, %v415_v22 }
 0x115   :  { %v414_v34 = vmax.f32 %v272_v24, 0.0  ;;  %v430_v35 = vmax.f32 %v352_v25, 0.0  ;;  %v281_v36 = vpop.f32.mrf.mxu0  ;;  %v361_v37 = vpop.f32.mrf.mxu1 }
 0x116   :  { %v417_v38 = vmax.f32 %v287_v29, 0.0  ;;  %v433_v39 = vmax.f32 %v367_v31, 0.0  ;;  %v282_v40 = vadd.f32 %v1128_v48, %v281_v36  ;;  %v362_v41 = vadd.f32 %v1128_v48, %v361_v37 }
 0x117   :  { %519 = vadd.xlane.f32.xlu1 %v468_v16  ;;  %487 = vadd.xlane.f32.xlu0 %v452_v17  ;;  %v469_v42 = vmul.f32 %v1137_v59, %v430_v35  ;;  %v453_v43 = vmul.f32 %v1137_v59, %v414_v34  ;;  %v917_v44 = vpop.f32.mrf.mxu0  ;;  %v941_v46 = vpop.f32.mrf.mxu1 }
 0x118   :  { %v297_v45 = vadd.f32 %v917_v44, %v1128_v48  ;;  %v377_v47 = vadd.f32 %v941_v46, %v1128_v48  ;;  %v472_v49 = vmul.f32 %v1137_v59, %v433_v39  ;;  %v456_v50 = vmul.f32 %v1137_v59, %v417_v38 }
 0x119   :  { %v416_v51 = vmax.f32 %v282_v40, 0.0  ;;  %v432_v52 = vmax.f32 %v362_v41, 0.0  ;;  %v291_v53 = vpop.f32.mrf.mxu0  ;;  %v371_v54 = vpop.f32.mrf.mxu1 }
 0x11a   :  { %v419_v55 = vmax.f32 %v297_v45, 0.0  ;;  %v435_v56 = vmax.f32 %v377_v47, 0.0  ;;  %v292_v57 = vadd.f32 %v1128_v48, %v291_v53  ;;  %v372_v58 = vadd.f32 %v1128_v48, %v371_v54 }
 0x11b   :  { %517 = vadd.xlane.f32.xlu1 %v467_v26  ;;  %485 = vadd.xlane.f32.xlu0 %v451_v27  ;;  %v471_v60 = vmul.f32 %v1137_v59, %v432_v52  ;;  %v455_v61 = vmul.f32 %v1137_v59, %v416_v51  ;;  %v920_v62 = vpop.f32.mrf.mxu0  ;;  %v944_v0 = vpop.f32.mrf.mxu1 }
 0x11c   :  { %v307_v63 = vadd.f32 %v920_v62, %v1128_v48  ;;  %v387_v1 = vadd.f32 %v944_v0, %v1128_v48  ;;  %v474_v2 = vmul.f32 %v1137_v59, %v435_v56  ;;  %v458_v3 = vmul.f32 %v1137_v59, %v419_v55 }
 0x11d   :  { %v418_v4 = vmax.f32 %v292_v57, 0.0  ;;  %v434_v5 = vmax.f32 %v372_v58, 0.0  ;;  %v301_v6 = vpop.f32.mrf.mxu0  ;;  %v381_v7 = vpop.f32.mrf.mxu1 }
 0x11e   :  { %v421_v8 = vmax.f32 %v307_v63, 0.0  ;;  %v437_v9 = vmax.f32 %v387_v1, 0.0  ;;  %v302_v12 = vadd.f32 %v1128_v48, %v301_v6  ;;  %v382_v13 = vadd.f32 %v1128_v48, %v381_v7 }
 0x11f   :  { %523 = vadd.xlane.f32.xlu1 %v470_v32  ;;  %491 = vadd.xlane.f32.xlu0 %v454_v33  ;;  %v923_v10 = vpop.f32.mrf.mxu0  ;;  %v947_v11 = vpop.f32.mrf.mxu1  ;;  %v473_v14 = vmul.f32 %v1137_v59, %v434_v5  ;;  %v457_v15 = vmul.f32 %v1137_v59, %v418_v4  ;;  %v611_v63 = vlaneseq  ;;  %v1216_v7 = vstv %s1334_s5  ;;  %s1080_s5 = smov [#allocation9]  }
 0x120   :  { %v317_v16 = vadd.f32 %v923_v10, %v1128_v48  ;;  %v397_v17 = vadd.f32 %v947_v11, %v1128_v48  ;;  %v476_v18 = vmul.f32 %v1137_v59, %v437_v9  ;;  %v460_v19 = vmul.f32 %v1137_v59, %v421_v8  ;;  %s811_s15 = sshll.u32 %s1080_s5, 4  ;;  %s812_s15 = int_to_ptr.vmem [resolvable:$true] %s811_s15 }
 0x121   :  { %v311_v20 = vpop.f32.mrf.mxu0  ;;  %v391_v21 = vpop.f32.mrf.mxu1  ;;  %v420_v22 = vmax.f32 %v302_v12, 0.0  ;;  %v436_v23 = vmax.f32 %v382_v13, 0.0  ;;  %v1210_v5 = vshrl.u32 %v611_v63, 7  ;;  %s1049_s16 = scalar_lea.vmem %s812_s15, 32  ;;  %p1054_p2 = scmp.lt.s32.totalorder %s812_s15, %s812_s15 }
 0x122   :  { %v423_v26 = vmax.f32 %v317_v16, 0.0  ;;  %v439_v27 = vmax.f32 %v397_v17, 0.0  ;;  %v312_v28 = vadd.f32 %v1128_v48, %v311_v20  ;;  %v392_v29 = vadd.f32 %v1128_v48, %v391_v21  ;;  %p1050_p1 = scmp.ne.s32.totalorder %s812_s15, %s1049_s16  ;;  %p1055_p3 = scmp.lt.s32.totalorder %s1049_s16, %s1049_s16 }
 0x123   :  { %521 = vadd.xlane.f32.xlu1 %v469_v42  ;;  %489 = vadd.xlane.f32.xlu0 %v453_v43  ;;  %v926_v24 = vpop.f32.mrf.mxu0  ;;  %v950_v25 = vpop.f32.mrf.mxu1  ;;  %v475_v30 = vmul.f32 %v1137_v59, %v436_v23  ;;  %v459_v31 = vmul.f32 %v1137_v59, %v420_v22 }
 0x124   :  { %v478_v34 = vmul.f32 %v1137_v59, %v439_v27  ;;  %v462_v35 = vmul.f32 %v1137_v59, %v423_v26  ;;  %v422_v36 = vmax.f32 %v312_v28, 0.0  ;;  %v438_v37 = vmax.f32 %v392_v29, 0.0  ;;  %p1056_p4 = por %p1055_p3, %p1054_p2 }
 0x125   :  { %v321_v32 = vpop.f32.mrf.mxu0  ;;  %v401_v33 = vpop.f32.mrf.mxu1  ;;  %v327_v40 = vadd.f32 %v926_v24, %v1128_v48  ;;  %v407_v41 = vadd.f32 %v950_v25, %v1128_v48 }
 0x126   :  { %v322_v38 = vadd.f32 %v1128_v48, %v321_v32  ;;  %v402_v39 = vadd.f32 %v1128_v48, %v401_v33  ;;  %v477_v44 = vmul.f32 %v1137_v59, %v438_v37  ;;  %v461_v45 = vmul.f32 %v1137_v59, %v422_v36  ;;  %p1057_p5 = pnand %p1056_p4, %p1050_p1 }
 0x127   :  { %527 = vadd.xlane.f32.xlu1 %v472_v49  ;;  %495 = vadd.xlane.f32.xlu0 %v456_v50  ;;  %v425_v46 = vmax.f32 %v327_v40, 0.0  ;;  %v441_v47 = vmax.f32 %v407_v41, 0.0 }
 0x128   :  { %v424_v42 = vmax.f32 %v322_v38, 0.0  ;;  %v440_v43 = vmax.f32 %v402_v39, 0.0 }
 0x129   :  { %v480_v51 = vmul.f32 %v1137_v59, %v441_v47  ;;  %v464_v48 = vmul.f32 %v1137_v59, %v425_v46 }
 0x12a   :  { %v479_v49 = vmul.f32 %v1137_v59, %v440_v43  ;;  %v463_v50 = vmul.f32 %v1137_v59, %v424_v42 }
 0x12b   :  { %525 = vadd.xlane.f32.xlu1 %v471_v60  ;;  %493 = vadd.xlane.f32.xlu0 %v455_v61 }
 0x12f   :  { %531 = vadd.xlane.f32.xlu1 %v474_v2  ;;  %499 = vadd.xlane.f32.xlu0 %v458_v3  ;;  %v1203_v2 = vand.u32 127, %v611_v63 }
 0x131   :  { %v624_v4 = vadd.s32 4294967280, %v1203_v2  ;;  %v617_v6 = vadd.s32 4294967288, %v1203_v2  ;;  %v631_v8 = vadd.s32 4294967272, %v1203_v2  ;;  %v615_v11 = vsub.s32 %v1203_v2, %v1210_v5 }
 0x132   :  { %v659_v23 = vadd.s32 4294967240, %v1203_v2  ;;  %v652_v32 = vadd.s32 4294967248, %v1203_v2  ;;  %v687_v63 = vadd.s32 4294967208, %v1203_v2 }
 0x133   :  { %529 = vadd.xlane.f32.xlu1 %v473_v14  ;;  %497 = vadd.xlane.f32.xlu0 %v457_v15  ;;  %v645_v14 = vadd.s32 4294967256, %v1203_v2  ;;  %v627_v15 = vsub.s32 %v624_v4, %v1210_v5  ;;  %v634_v22 = vsub.s32 %v631_v8, %v1210_v5 }
 0x134   :  { %v1245_v39 = vsub.s32 %v659_v23, %v1210_v5  ;;  %v655_v47 = vsub.s32 %v652_v32, %v1210_v5 }
 0x135   :  { %v648_v28 = vsub.s32 %v645_v14, %v1210_v5 }
 0x137   :  { %535 = vadd.xlane.f32.xlu1 %v476_v18  ;;  %503 = vadd.xlane.f32.xlu0 %v460_v19  ;;  %v638_v18 = vadd.s32 4294967264, %v1203_v2  ;;  %v620_v19 = vsub.s32 %v617_v6, %v1210_v5 }
 0x13b   :  { %533 = vadd.xlane.f32.xlu1 %v475_v30  ;;  %501 = vadd.xlane.f32.xlu0 %v459_v31  ;;  %v641_v31 = vsub.s32 %v638_v18, %v1210_v5  ;;  %v690_v18 = vsub.s32 %v687_v63, %v1210_v5 }
 0x13f   :  { %539 = vadd.xlane.f32.xlu1 %v478_v34  ;;  %507 = vadd.xlane.f32.xlu0 %v462_v35 }
 0x143   :  { %537 = vadd.xlane.f32.xlu1 %v477_v44  ;;  %505 = vadd.xlane.f32.xlu0 %v461_v45  ;;  %v673_v44 = vadd.s32 4294967224, %v1203_v2 }
 0x147   :  { %541 = vadd.xlane.f32.xlu1 %v479_v49  ;;  %509 = vadd.xlane.f32.xlu0 %v463_v50  ;;  %v666_v49 = vadd.s32 4294967232, %v1203_v2 }
 0x149   :  { %v669_v4 = vsub.s32 %v666_v49, %v1210_v5 }
 0x14b   :  { %543 = vadd.xlane.f32.xlu1 %v480_v51  ;;  %511 = vadd.xlane.f32.xlu0 %v464_v48 }
 0x198   :  { %v516_v52 = vpop.xlane.xlu1 %515  ;;  %v484_v53 = vpop.xlane.xlu0 %483 }
 0x199   :  { %v564_v20 = vadd.f32 %v1216_v7, %v516_v52  ;;  %v548_v21 = vadd.f32 %v1216_v7, %v484_v53 }
 0x19b   :  { %v729_v33 = vrot.slane %v564_v20, %v620_v19  ;;  %v621_v34 = vrot.slane %v548_v21, %v620_v19  ;;  %v701_v21 = vadd.s32 4294967192, %v1203_v2 }
 0x19c   :  { %v514_v54 = vpop.xlane.xlu1 %513  ;;  %v482_v55 = vpop.xlane.xlu0 %481 }
 0x19d   :  { %v563_v12 = vadd.f32 %v1216_v7, %v514_v54  ;;  %v547_v13 = vadd.f32 %v1216_v7, %v482_v55 }
 0x19f   :  { %v725_v26 = vrot.slane %v563_v12, %v615_v11  ;;  %v616_v27 = vrot.slane %v547_v13, %v615_v11 }
 0x1a0   :  { %v520_v56 = vpop.xlane.xlu1 %519  ;;  %v488_v57 = vpop.xlane.xlu0 %487 }
 0x1a1   :  { %v566_v37 = vadd.f32 %v1216_v7, %v520_v56  ;;  %v550_v38 = vadd.f32 %v1216_v7, %v488_v57  ;;  %v730_v42 = vsel %vm622_vm0, %v729_v33, %v725_v26  ;;  %v623_v43 = vsel %vm622_vm0, %v621_v34, %v616_v27 }
 0x1a3   :  { %v739_v53 = vrot.slane %v566_v37, %v634_v22  ;;  %v635_v54 = vrot.slane %v550_v38, %v634_v22  ;;  %v694_v22 = vadd.s32 4294967200, %v1203_v2  ;;  %v708_v38 = vadd.s32 4294967184, %v1203_v2 }
 0x1a4   :  { %v518_v58 = vpop.xlane.xlu1 %517  ;;  %v486_v60 = vpop.xlane.xlu0 %485 }
 0x1a5   :  { %v565_v16 = vadd.f32 %v1216_v7, %v518_v58  ;;  %v549_v17 = vadd.f32 %v1216_v7, %v486_v60  ;;  %v1261_v60 = vsub.s32 %v673_v44, %v1210_v5  ;;  %v697_v37 = vsub.s32 %v694_v22, %v1210_v5 }
 0x1a7   :  { %v734_v29 = vrot.slane %v565_v16, %v627_v15  ;;  %v628_v30 = vrot.slane %v549_v17, %v627_v15 }
 0x1a8   :  { %v1199_v61 = vpop.xlane.xlu1 %523  ;;  %v1201_v62 = vpop.xlane.xlu0 %491 }
 0x1a9   :  { %v735_v45 = vsel %vm629_vm1, %v734_v29, %v730_v42  ;;  %v630_v46 = vsel %vm629_vm1, %v628_v30, %v623_v43  ;;  %v568_v55 = vadd.f32 %v1216_v7, %v1199_v61  ;;  %v552_v56 = vadd.f32 %v1216_v7, %v1201_v62 }
 0x1aa   :  { %v680_v61 = vadd.s32 4294967216, %v1203_v2 }
 0x1ab   :  { %v649_v11 = vrot.slane %v552_v56, %v648_v28 }
 0x1ac   :  { %v522_v0 = vpop.xlane.xlu1 %521  ;;  %v490_v1 = vpop.xlane.xlu0 %489 }
 0x1ad   :  { %v567_v35 = vadd.f32 %v1216_v7, %v522_v0  ;;  %v551_v36 = vadd.f32 %v1216_v7, %v490_v1  ;;  %v740_v0 = vsel %vm636_vm2, %v739_v53, %v735_v45  ;;  %v637_v1 = vsel %vm636_vm2, %v635_v54, %v630_v46 }
 0x1af   :  { %v744_v50 = vrot.slane %v567_v35, %v641_v31  ;;  %v642_v51 = vrot.slane %v551_v36, %v641_v31  ;;  %v704_v36 = vsub.s32 %v701_v21, %v1210_v5 }
 0x1b0   :  { %v1205_v59 = vpop.xlane.xlu1 %527  ;;  %v1207_v3 = vpop.xlane.xlu0 %495 }
 0x1b1   :  { %v745_v6 = vsel %vm643_vm3, %v744_v50, %v740_v0  ;;  %v644_v62 = vsel %vm643_vm3, %v642_v51, %v637_v1  ;;  %v570_v16 = vadd.f32 %v1216_v7, %v1205_v59  ;;  %v554_v17 = vadd.f32 %v1216_v7, %v1207_v3 }
 0x1b2   :  { %v651_v20 = vsel %vm650_vm4, %v649_v11, %v644_v62  ;;  %v683_v59 = vsub.s32 %v680_v61, %v1210_v5 }
 0x1b3   :  { %v759_v32 = vrot.slane %v570_v16, %v1245_v39  ;;  %v663_v33 = vrot.slane %v554_v17, %v1245_v39 }
 0x1b4   :  { %v526_v9 = vpop.xlane.xlu1 %525  ;;  %v494_v10 = vpop.xlane.xlu0 %493 }
 0x1b5   :  { %v569_v48 = vadd.f32 %v1216_v7, %v526_v9  ;;  %v553_v52 = vadd.f32 %v1216_v7, %v494_v10  ;;  %v749_v10 = vrot.slane %v568_v55, %v648_v28 }
 0x1b7   :  { %v754_v8 = vrot.slane %v569_v48, %v655_v47  ;;  %v656_v9 = vrot.slane %v553_v52, %v655_v47  ;;  %v750_v19 = vsel %vm650_vm4, %v749_v10, %v745_v6  ;;  %v711_v48 = vsub.s32 %v708_v38, %v1210_v5 }
 0x1b8   :  { %v1233_v24 = vpop.xlane.xlu1 %531  ;;  %v1235_v25 = vpop.xlane.xlu0 %499  ;;  %v715_v52 = vadd.s32 4294967176, %v1203_v2 }
 0x1b9   :  { %v755_v23 = vsel %vm657_vm5, %v754_v8, %v750_v19  ;;  %v658_v26 = vsel %vm657_vm5, %v656_v9, %v651_v20  ;;  %v572_v34 = vadd.f32 %v1216_v7, %v1233_v24  ;;  %v556_v35 = vadd.f32 %v1216_v7, %v1235_v25 }
 0x1ba   :  { %v718_v9 = vsub.s32 %v715_v52, %v1210_v5 }
 0x1bb   :  { %v769_v47 = vrot.slane %v572_v34, %v1261_v60  ;;  %v677_v49 = vrot.slane %v556_v35, %v1261_v60 }
 0x1bc   :  { %v530_v40 = vpop.xlane.xlu1 %529  ;;  %v498_v41 = vpop.xlane.xlu0 %497 }
 0x1bd   :  { %v571_v12 = vadd.f32 %v1216_v7, %v530_v40  ;;  %v555_v13 = vadd.f32 %v1216_v7, %v498_v41  ;;  %v760_v40 = vsel %vm664_vm6, %v759_v32, %v755_v23  ;;  %v665_v41 = vsel %vm664_vm6, %v663_v33, %v658_v26 }
 0x1bf   :  { %v764_v27 = vrot.slane %v571_v12, %v669_v4  ;;  %v670_v3 = vrot.slane %v555_v13, %v669_v4 }
 0x1c0   :  { %v536_v57 = vpop.xlane.xlu1 %535  ;;  %v504_v58 = vpop.xlane.xlu0 %503 }
 0x1c1   :  { %v574_v42 = vadd.f32 %v1216_v7, %v536_v57  ;;  %v558_v39 = vadd.f32 %v1216_v7, %v504_v58  ;;  %v765_v24 = vsel %vm671_vm7, %v764_v27, %v760_v40  ;;  %v672_v43 = vsel %vm671_vm7, %v670_v3, %v665_v41 }
 0x1c2   :  { %v770_v55 = vsel %vm678_vm8, %v769_v47, %v765_v24  ;;  %v679_v56 = vsel %vm678_vm8, %v677_v49, %v672_v43 }
 0x1c3   :  { %v779_v53 = vrot.slane %v574_v42, %v690_v18  ;;  %v691_v54 = vrot.slane %v558_v39, %v690_v18 }
 0x1c4   :  { %v534_v14 = vpop.xlane.xlu1 %533  ;;  %v502_v15 = vpop.xlane.xlu0 %501 }
 0x1c5   :  { %v573_v28 = vadd.f32 %v1216_v7, %v534_v14  ;;  %v557_v29 = vadd.f32 %v1216_v7, %v502_v15 }
 0x1c7   :  { %v774_v25 = vrot.slane %v573_v28, %v683_v59  ;;  %v684_v44 = vrot.slane %v557_v29, %v683_v59 }
 0x1c8   :  { %v540_v30 = vpop.xlane.xlu1 %539  ;;  %v508_v31 = vpop.xlane.xlu0 %507 }
 0x1c9   :  { %v775_v57 = vsel %vm685_vm9, %v774_v25, %v770_v55  ;;  %v686_v58 = vsel %vm685_vm9, %v684_v44, %v679_v56  ;;  %v576_v4 = vadd.f32 %v1216_v7, %v540_v30  ;;  %v560_v61 = vadd.f32 %v1216_v7, %v508_v31 }
 0x1ca   :  { %v780_v62 = vsel %vm692_vm10, %v779_v53, %v775_v57  ;;  %v693_v8 = vsel %vm692_vm10, %v691_v54, %v686_v58 }
 0x1cb   :  { %v789_v16 = vrot.slane %v576_v4, %v704_v36  ;;  %v705_v17 = vrot.slane %v560_v61, %v704_v36 }
 0x1cc   :  { %v538_v45 = vpop.xlane.xlu1 %537  ;;  %v506_v46 = vpop.xlane.xlu0 %505 }
 0x1cd   :  { %v575_v50 = vadd.f32 %v1216_v7, %v538_v45  ;;  %v559_v51 = vadd.f32 %v1216_v7, %v506_v46 }
 0x1cf   :  { %v784_v60 = vrot.slane %v575_v50, %v697_v37  ;;  %v698_v63 = vrot.slane %v559_v51, %v697_v37 }
 0x1d0   :  { %v542_v0 = vpop.xlane.xlu1 %541  ;;  %v510_v1 = vpop.xlane.xlu0 %509 }
 0x1d1   :  { %v577_v2 = vadd.f32 %v1216_v7, %v542_v0  ;;  %v561_v6 = vadd.f32 %v1216_v7, %v510_v1  ;;  %v785_v10 = vsel %vm699_vm11, %v784_v60, %v780_v62  ;;  %v700_v11 = vsel %vm699_vm11, %v698_v63, %v693_v8 }
 0x1d2   :  { %v790_v5 = vsel %vm706_vm12, %v789_v16, %v785_v10  ;;  %v707_v20 = vsel %vm706_vm12, %v705_v17, %v700_v11 }
 0x1d3   :  { %v794_v12 = vrot.slane %v577_v2, %v711_v48  ;;  %v712_v13 = vrot.slane %v561_v6, %v711_v48 }
 0x1d4   :  { %v544_v14 = vpop.xlane.xlu1 %543  ;;  %v512_v15 = vpop.xlane.xlu0 %511 }
 0x1d5   :  { %v578_v18 = vadd.f32 %v1216_v7, %v544_v14  ;;  %v562_v19 = vadd.f32 %v1216_v7, %v512_v15  ;;  %v795_v23 = vsel %vm713_vm13, %v794_v12, %v790_v5  ;;  %v714_v26 = vsel %vm713_vm13, %v712_v13, %v707_v20 }
 0x1d7   :  { %v799_v21 = vrot.slane %v578_v18, %v718_v9  ;;  %v719_v22 = vrot.slane %v562_v19, %v718_v9 }
 0x1d9   :  { %v721_v59 = vsel %vm720_vm14, %v719_v22, %v714_v26  ;;  %v800_v27 = vsel %vm720_vm14, %v799_v21, %v795_v23 }
 0x1da   :  { %v802_v3 = vsel %vm801_vm15, %v800_v27, %v721_v59 }
 0x1db   :  { %804 = vst [vmem:[#allocation9] sm:$0x3] %v802_v3 }
 0x1dc   :  { %1060 = shalt.err (!%p1057_p5)
}
 0x1dd   :  { %814 = dma.vmem_to_hbm [thread:$0]  %s812_s15, 32, %s1335_s6, [#allocation5]  }
 0x1de   :  { %1073 = dma.done.wait [#allocation5], 32  }
 0x1df   :  { %1074 = vsyncadd [#allocation5], 4294967264 }
 0x1e0   :  { %818 = vsyncpa [#allocation4], 1 }
 0x1e1   :  { %819 = vsyncpa [#allocation7], 1 }
 0x1e2   :  { %820 = vsyncpa [#allocation5], 1 }

</bundles_post_ra>
